<compile_context>
chip_gen: v5e
topology: v5e:2x2
jax: 0.10.0
libtpu: 0.0.40
codegen_flags: <defaults>
</compile_context>

<pallas_src>
import jax
import jax.numpy as jnp
from jax.experimental import pallas as pl
from jax.experimental.pallas import tpu as pltpu

NUM_TASKS = 3


def _multitask_loss_kernel(p_ref, l_ref, out_ref):
    # p_ref, l_ref: (1, num) f32 in VMEM.
    # out_ref:      (1, 1)  f32 in SMEM (scalar result).
    p = p_ref[...]                              # (1, num)
    l = l_ref[...]                              # (1, num)
    weighted = 0.5 * jnp.exp(-p) * l + p        # VPU/EUP elementwise, f32
    out_ref[0, 0] = jnp.sum(weighted)           # full reduce -> scalar SMEM store


def _multitask_loss_fwd_impl(params, losses):
    """params: (num,) f32.  losses: (num,) f32 (stacked per-task losses)."""
    params = jnp.asarray(params, jnp.float32)
    losses = jnp.asarray(losses, jnp.float32)
    num = params.shape[0]
    assert losses.shape == (num,), "losses must be a stacked (num,) array"

    # Free metadata reshapes -> lane-major (1, num) tiles; no concatenate,
    # no extra HBM buffer, both inputs DMA'd concurrently by Pallas.
    p2 = params.reshape(1, num)
    l2 = losses.reshape(1, num)

    out = pl.pallas_call(
        _multitask_loss_kernel,
        out_shape=jax.ShapeDtypeStruct((1, 1), jnp.float32),
        in_specs=[
            pl.BlockSpec(memory_space=pltpu.MemorySpace.VMEM),
            pl.BlockSpec(memory_space=pltpu.MemorySpace.VMEM),
        ],
        out_specs=pl.BlockSpec(memory_space=pltpu.MemorySpace.SMEM),
        cost_estimate=pl.CostEstimate(
            flops=4 * num,                 # mul, mul, add, partial sums
            transcendentals=num,           # exp per task
            bytes_accessed=8 * num + 4,    # two (num,) f32 in, one f32 out
        ),
    )(p2, l2)
    return out[0, 0]  # scalar, matching the PyTorch scalar loss sum


@jax.custom_vjp
def multitask_loss(params, losses):
    return _multitask_loss_fwd_impl(params, losses)


def _multitask_loss_fwd(params, losses):
    return _multitask_loss_fwd_impl(params, losses), (params, losses)


def _multitask_loss_bwd(res, g):
    params, losses = res
    params = jnp.asarray(params, jnp.float32)
    losses = jnp.asarray(losses, jnp.float32)
    e = 0.5 * jnp.exp(-params)
    dparams = g * (1.0 - e * losses)
    dlosses = g * e
    return dparams, dlosses


multitask_loss.defvjp(_multitask_loss_fwd, _multitask_loss_bwd)


if __name__ == "__main__":
    key = jax.random.PRNGKey(0)

    # Deterministic parameter init: torch.ones(num) in the reference module.
    params = jnp.ones((NUM_TASKS,), dtype=jnp.float32)

    # Example per-task losses, stacked once into a (num,) array upstream.
    losses = jnp.abs(jax.random.normal(key, (NUM_TASKS,), dtype=jnp.float32))

    out = multitask_loss(params, losses)
    out = jax.block_until_ready(out)

    # Reference check in plain JAX (mirrors the PyTorch forward exactly).
    ref = jnp.sum(0.5 * jnp.exp(-params) * losses + params)
    assert jnp.allclose(out, ref, rtol=1e-6, atol=1e-6), (out, ref)

    # Gradient check against the analytic formulas (custom_vjp path).
    dparams, dlosses = jax.grad(multitask_loss, argnums=(0, 1))(params, losses)
    ref_dp = 1.0 - 0.5 * jnp.exp(-params) * losses
    ref_dl = 0.5 * jnp.exp(-params)
    assert jnp.allclose(dparams, ref_dp, rtol=1e-6, atol=1e-6)
    assert jnp.allclose(dlosses, ref_dl, rtol=1e-6, atol=1e-6)

    print("KERNEL_OK")
</pallas_src>

<mosaic_0001>
module attributes {stable_mosaic.version = 11 : i64} {
  func.func @_multitask_loss_kernel(%arg0: memref<1x3xf32, #tpu.memory_space<vmem>>, %arg1: memref<1x3xf32, #tpu.memory_space<vmem>>, %arg2: memref<1x1xf32, #tpu.memory_space<smem>>) attributes {dimension_semantics = [], scalar_prefetch = 0 : i64, scratch_operands = 0 : i64, tpu.core_type = #tpu.core_type<tc>} {
    %c0 = arith.constant 0 : index
    %c0_0 = arith.constant 0 : index
    %0 = vector.load %arg0[%c0, %c0_0] : memref<1x3xf32, #tpu.memory_space<vmem>>, vector<1x3xf32>
    %c0_1 = arith.constant 0 : index
    %c0_2 = arith.constant 0 : index
    %1 = vector.load %arg1[%c0_1, %c0_2] : memref<1x3xf32, #tpu.memory_space<vmem>>, vector<1x3xf32>
    %cst = arith.constant 0.000000e+00 : f32
    %2 = vector.broadcast %cst : f32 to vector<1x3xf32>
    %3 = arith.subf %2, %0 : vector<1x3xf32>
    %4 = math.exp %3 : vector<1x3xf32>
    %cst_3 = arith.constant 5.000000e-01 : f32
    %5 = vector.broadcast %cst_3 : f32 to vector<1x3xf32>
    %6 = arith.mulf %5, %4 : vector<1x3xf32>
    %7 = arith.mulf %6, %1 : vector<1x3xf32>
    %8 = arith.addf %7, %0 : vector<1x3xf32>
    %9 = vector.shape_cast %8 : vector<1x3xf32> to vector<1x1x3xf32>
    %cst_4 = arith.constant dense<0.000000e+00> : vector<1xf32>
    %10 = vector.multi_reduction <add>, %9, %cst_4 [1, 2] : vector<1x1x3xf32> to vector<1xf32>
    %11 = vector.shape_cast %10 : vector<1xf32> to vector<1x1x1xf32>
    %12 = vector.extract %11[0, 0, 0] : f32 from vector<1x1x1xf32>
    %c0_5 = arith.constant 0 : index
    %c0_6 = arith.constant 0 : index
    %13 = memref.load %arg2[%c0_5, %c0_6] : memref<1x1xf32, #tpu.memory_space<smem>>
    memref.store %12, %arg2[%c0_5, %c0_6] : memref<1x1xf32, #tpu.memory_space<smem>>
    return
  }
}

</mosaic_0001>

<bundles_post_ra>
// kernel: tpu_custom_call.1
= control target key start
LH: loop header
LB: loop body
LE: loop exit
PB: predicated region body
PF: predicated region fallthrough
CT: control target
= control target key end

     0   :  { %7 = vsyncpa [#allocation3], 0  ;;  %s178_s0 = inlined_call_operand.hbm [shape: f32[1,3], index: 0, kind: input, shape index: {}]   ;;  %s179_s1 = inlined_call_operand.hbm [shape: f32[1,3], index: 1, kind: input, shape index: {}]   ;;  %s180_s2 = inlined_call_operand.hbm [shape: f32[1,1], index: 2, kind: output, shape index: {}]  }
   0x1   :  { %8 = vsyncpa [#allocation6], 0 }
   0x2   :  { %9 = vsyncpa [#allocation4], 0  ;;  %s15_s11 = sshll.u32 %s178_s0, 4  ;;  %s151_s12 = smov [#allocation2]   ;;  %s16_s11 = int_to_ptr.hbm [resolvable:$true] %s15_s11 }
   0x3   :  { %s17_s13 = sshll.u32 %s151_s12, 4  ;;  %s26_s16 = sshll.u32 %s179_s1, 4  ;;  %s18_s13 = int_to_ptr.vmem [resolvable:$true] %s17_s13  ;;  %s27_s16 = int_to_ptr.hbm [resolvable:$true] %s26_s16 }
   0x4   :  { %20 = dma.hbm_to_vmem [thread:$0]  %s16_s11, 16, %s18_s13, [#allocation3]  }
   0x5   :  { %s152_s17 = smov [#allocation5]  }
   0x6   :  { %s28_s18 = sshll.u32 %s152_s17, 4  ;;  %s29_s18 = int_to_ptr.vmem [resolvable:$true] %s28_s18 }
   0x7   :  { %31 = dma.hbm_to_vmem [thread:$0]  %s27_s16, 16, %s29_s18, [#allocation6]  }
   0x8   :  { %145 = dma.done.wait [#allocation3], 16  }
   0x9   :  { %146 = vsyncadd [#allocation3], 4294967280 }
   0xa   :  { %147 = dma.done.wait [#allocation6], 16  }
   0xb   :  { %148 = vsyncadd [#allocation6], 4294967280  ;;  %v40_v0 = vld [vmem:[#allocation2] sm:$0x1]  ;;  %v41_v4 = vld [vmem:[#allocation5] sm:$0x1] }
   0xc   :  { %v42_v1 = vsub.f32 0.0, %v40_v0  ;;  %vm48_vm0 = vcmask 16384   ;;  %s66_s19 = sshll.u32 %s180_s2, 4  ;;  %s153_s21 = smov [#allocation7]   ;;  %s67_s19 = int_to_ptr.hbm [resolvable:$true] %s66_s19 }
   0xe   :  { %v43_v2 = vmul.f32 1.442695, %v42_v1 }
  0x10   :  { %83 = vpow2.f32 %v43_v2 }
  0x16   :  { %v84_v3 = vpop.eup %83 }
  0x17   :  { %v45_v5 = vmul.f32 0.5, %v84_v3 }
  0x19   :  { %v46_v6 = vmul.f32 %v45_v5, %v41_v4 }
  0x1b   :  { %v47_v7 = vadd.f32 %v46_v6, %v40_v0 }
  0x1d   :  { %v49_v8 = vsel %vm48_vm0, %v47_v7, 0.0 }
  0x1e   :  { %50 = vadd.xlane.f32.xlu0 %v49_v8 }
  0x91   :  { %v51_v9 = vpop.xlane.xlu0 %50 }
  0x92   :  { %v52_v10 = vrot.slane %v51_v9, 4 }
  0x94   :  { %v53_v11 = vadd.f32 %v52_v10, %v51_v9 }
  0x96   :  { %v54_v12 = vrot.slane %v53_v11, 2 }
  0x98   :  { %v55_v13 = vadd.f32 %v54_v12, %v53_v11 }
  0x9a   :  { %v56_v14 = vrot.slane %v55_v13, 1 }
  0x9c   :  { %v57_v15 = vadd.f32 %v56_v14, %v55_v13 }
  0x9e   :  { %78 = vpush %v57_v15 }
  0xcf   :  { %s79_s20 = spop %78 }
  0xd0   :  { %60 = sst [smem:[#allocation7]] %s79_s20 }
  0xd1   :  { %69 = dma.smem_to_hbm %s153_s21, 16, %s67_s19, [#allocation4]  }
  0xd2   :  { %149 = dma.done.wait [#allocation4], 16  }
  0xd3   :  { %150 = vsyncadd [#allocation4], 4294967280 }
  0xd4   :  { %74 = sfence }
  0xd5   :  { %75 = vsyncpa [#allocation3], 1 }
  0xd6   :  { %76 = vsyncpa [#allocation6], 1 }
  0xd7   :  { %77 = vsyncpa [#allocation4], 1 }

</bundles_post_ra>
